<compile_context>
chip_gen: v5e
topology: v5e:2x2
jax: 0.10.0
libtpu: 0.0.40
codegen_flags: <defaults>
</compile_context>

<pallas_src>
import functools

import jax
import jax.numpy as jnp
from jax.experimental import pallas as pl
from jax.experimental.pallas import tpu as pltpu


def _round_up(x, m):
    return ((x + m - 1) // m) * m


def _adaptive_ln_kernel(x_ref, g_ref, wa_ref, wc_ref, ba_ref, bc_ref, o_ref,
                        *, nout, eps):
    # LayerNorm statistics in fp32 regardless of input dtype.
    x = x_ref[...].astype(jnp.float32)

    # Conditioning projection: operands in native dtype, fp32 accumulation.
    g = g_ref[...]
    a = jnp.dot(g, wa_ref[...], preferred_element_type=jnp.float32)
    a = a + ba_ref[...].astype(jnp.float32)
    c = jnp.dot(g, wc_ref[...], preferred_element_type=jnp.float32)
    c = c + bc_ref[...].astype(jnp.float32)

    # One-pass statistics: zero-padded feature columns contribute nothing to
    # either sum, so no column mask is needed; inv_n uses the true count.
    inv_n = jnp.float32(1.0 / nout)
    mean = jnp.sum(x, axis=-1, keepdims=True) * inv_n
    var = jnp.sum(x * x, axis=-1, keepdims=True) * inv_n - mean * mean
    xhat = (x - mean) * jax.lax.rsqrt(var + jnp.float32(eps))

    # Padded output columns come out zero (padded W/b columns are zero).
    o_ref[...] = (a * xhat + c).astype(o_ref.dtype)


def prepare_adaptive_ln_params(w_proj, b_proj, gamma, beta):
    """Fold the inner LayerNorm affine into the conditioning projection and pad
    the folded weights to lane-aligned shapes.  Run ONCE at parameter load.

      out = weight * (gamma*xhat + beta) + bias
          = (g @ (W_w*gamma) + b_w*gamma) * xhat
            + (g @ (W_w*beta + W_b) + b_w*beta + b_b)

    w_proj: [ncond, 2*nout], b_proj: [2*nout]   (project_layer)
    gamma, beta: [nout]                          (inner LayerNorm affine)
    """
    ncond, two_nout = w_proj.shape
    nout = two_nout // 2
    w_w, w_b = w_proj[:, :nout], w_proj[:, nout:]
    b_w, b_b = b_proj[:nout], b_proj[nout:]

    w_a = w_w * gamma[None, :]
    b_a = b_w * gamma
    w_c = w_w * beta[None, :] + w_b
    b_c = b_w * beta + b_b

    npad = _round_up(nout, 128)    # lane-dense feature dim
    cpad = _round_up(ncond, 128)   # lane-dense / MXU-friendly cond dim
    w_a = jnp.pad(w_a, ((0, cpad - ncond), (0, npad - nout)))
    w_c = jnp.pad(w_c, ((0, cpad - ncond), (0, npad - nout)))
    b_a = jnp.pad(b_a, (0, npad - nout)).reshape(1, npad)
    b_c = jnp.pad(b_c, (0, npad - nout)).reshape(1, npad)
    return dict(w_a=w_a, w_c=w_c, b_a=b_a, b_c=b_c, nout=nout, ncond=ncond)


def adaptive_layer_norm(x, g, params, *, eps=1e-12, tm=512):
    """x: [B, T, nout], g: [B, T, ncond]. Returns [B, T, nout]."""
    B, T, nout = x.shape
    ncond = g.shape[-1]
    assert nout == params["nout"] and ncond == params["ncond"]
    M = B * T

    w_a, w_c, b_a, b_c = params["w_a"], params["w_c"], params["b_a"], params["b_c"]
    cpad, npad = w_a.shape

    # No row padding (ragged last tile handled by Pallas); feature / cond
    # padding only when the dim is not already 128-aligned.
    x2 = x.reshape(M, nout)
    g2 = g.reshape(M, ncond)
    if npad != nout:
        x2 = jnp.pad(x2, ((0, 0), (0, npad - nout)))
    if cpad != ncond:
        g2 = jnp.pad(g2, ((0, 0), (0, cpad - ncond)))

    # Row tile: big for bandwidth, but keep >= 2 tiles so both TensorCores of
    # a megacore chip get work, and shrink until buffers fit the VMEM budget.
    tm = max(8, min(tm, _round_up(pl.cdiv(M, 2), 8)))

    try:
        phys_vmem = pltpu.get_tpu_info().vmem_capacity_bytes
    except Exception:  # interpret mode / older runtimes
        phys_vmem = 64 * 1024 * 1024
    vmem_limit = int(min(phys_vmem * 3 // 4, 100 * 1024 * 1024))

    x_bytes = x2.dtype.itemsize
    g_bytes = g2.dtype.itemsize
    w_bytes = w_a.dtype.itemsize

    def _vmem_need(t):
        io = 2 * t * (npad * x_bytes + cpad * g_bytes + npad * x_bytes)  # dbl-buffered x/g/out
        temps = 6 * t * npad * 4                                         # fp32 intermediates
        weights = 2 * cpad * npad * w_bytes + 4 * npad * 4               # single-buffered
        return io + temps + weights

    while tm > 8 and _vmem_need(tm) > vmem_limit * 3 // 4:
        tm = max(8, _round_up(tm // 2, 8))
    # TODO(synk): for very large cpad*npad weights (> ~24 MiB) add a second grid
    # axis over output columns so W_A/W_C need not be fully resident (required
    # to fit v7x's 64 MiB VMEM at big model dims).

    kernel = functools.partial(_adaptive_ln_kernel, nout=nout, eps=eps)
    resident = pl.Buffered(1)  # constant block index -> no double buffering

    out = pl.pallas_call(
        kernel,
        out_shape=jax.ShapeDtypeStruct((M, npad), x.dtype),
        grid_spec=pltpu.PrefetchScalarGridSpec(
            num_scalar_prefetch=0,
            grid=(pl.cdiv(M, tm),),
            in_specs=[
                pl.BlockSpec((tm, npad), lambda i: (i, 0)),    # x tile
                pl.BlockSpec((tm, cpad), lambda i: (i, 0)),    # g tile
                pl.BlockSpec((cpad, npad), lambda i: (0, 0),
                             pipeline_mode=resident),          # W_A (resident)
                pl.BlockSpec((cpad, npad), lambda i: (0, 0),
                             pipeline_mode=resident),          # W_C (resident)
                pl.BlockSpec((1, npad), lambda i: (0, 0),
                             pipeline_mode=resident),          # b_A
                pl.BlockSpec((1, npad), lambda i: (0, 0),
                             pipeline_mode=resident),          # b_C
            ],
            out_specs=pl.BlockSpec((tm, npad), lambda i: (i, 0)),
        ),
        compiler_params=pltpu.CompilerParams(
            dimension_semantics=("parallel",),
            vmem_limit_bytes=vmem_limit,
        ),
    )(x2, g2, w_a, w_c, b_a, b_c)

    if npad != nout:
        out = out[:, :nout]
    return out.reshape(B, T, nout)


def _reference(x, g, w_proj, b_proj, gamma, beta, eps=1e-12):
    proj = jnp.einsum("btc,cn->btn", g, w_proj) + b_proj
    nout = x.shape[-1]
    weight, bias = proj[..., :nout], proj[..., nout:]
    mean = jnp.mean(x, axis=-1, keepdims=True)
    var = jnp.mean((x - mean) ** 2, axis=-1, keepdims=True)
    normed = (x - mean) / jnp.sqrt(var + eps) * gamma + beta
    return weight * normed + bias


if __name__ == "__main__":
    B, T = 2, 8
    ncond, nout = 16, 32
    eps = 1e-12

    key = jax.random.PRNGKey(0)
    kx, kg, kw, kb, kgam, kbet = jax.random.split(key, 6)

    x = jax.random.normal(kx, (B, T, nout), dtype=jnp.float32)
    g = jax.random.normal(kg, (B, T, ncond), dtype=jnp.float32)

    # Synthetic parameters with the module's shapes:
    #   project_layer: Linear(ncond, 2*nout)  -> W [ncond, 2*nout], b [2*nout]
    #   norm: LayerNorm(nout)                 -> gamma [nout], beta [nout]
    w_proj = jax.random.normal(kw, (ncond, 2 * nout), dtype=jnp.float32) * 0.1
    b_proj = jax.random.normal(kb, (2 * nout,), dtype=jnp.float32) * 0.1
    gamma = jnp.ones((nout,), jnp.float32) + 0.05 * jax.random.normal(
        kgam, (nout,), jnp.float32)
    beta = 0.05 * jax.random.normal(kbet, (nout,), jnp.float32)

    # One-time parameter preparation (hoisted out of the per-call path).
    params = prepare_adaptive_ln_params(w_proj, b_proj, gamma, beta)

    out = adaptive_layer_norm(x, g, params, eps=eps)
    out = jax.block_until_ready(out)

    ref = _reference(x, g, w_proj, b_proj, gamma, beta, eps=eps)
    assert out.shape == (B, T, nout)
    assert jnp.allclose(out, ref, atol=5e-5, rtol=1e-5), "mismatch vs reference"

    print("KERNEL_OK")
</pallas_src>

<mosaic_0001>
module attributes {stable_mosaic.version = 11 : i64} {
  func.func @_adaptive_ln_kernel(%arg0: i32, %arg1: memref<8x128xf32, #tpu.memory_space<vmem>>, %arg2: memref<8x128xf32, #tpu.memory_space<vmem>>, %arg3: memref<128x128xf32, #tpu.memory_space<vmem>>, %arg4: memref<128x128xf32, #tpu.memory_space<vmem>>, %arg5: memref<1x128xf32, #tpu.memory_space<vmem>>, %arg6: memref<1x128xf32, #tpu.memory_space<vmem>>, %arg7: memref<8x128xf32, #tpu.memory_space<vmem>>) attributes {dimension_semantics = [#tpu.dimension_semantics<parallel>], iteration_bounds = array<i64: 2>, scalar_prefetch = 0 : i64, scratch_operands = 0 : i64, tpu.core_type = #tpu.core_type<tc>, window_params = [{transform_indices = @transform_0, window_bounds = array<i64: 8, 128>}, {transform_indices = @transform_1, window_bounds = array<i64: 8, 128>}, {pipeline_mode = #tpu.pipeline_mode<synchronous>, transform_indices = @transform_2, window_bounds = array<i64: 128, 128>}, {pipeline_mode = #tpu.pipeline_mode<synchronous>, transform_indices = @transform_3, window_bounds = array<i64: 128, 128>}, {pipeline_mode = #tpu.pipeline_mode<synchronous>, transform_indices = @transform_4, window_bounds = array<i64: 1, 128>}, {pipeline_mode = #tpu.pipeline_mode<synchronous>, transform_indices = @transform_5, window_bounds = array<i64: 1, 128>}, {transform_indices = @transform_6, window_bounds = array<i64: 8, 128>}]} {
    %c0 = arith.constant 0 : index
    %c0_0 = arith.constant 0 : index
    %0 = vector.load %arg1[%c0, %c0_0] : memref<8x128xf32, #tpu.memory_space<vmem>>, vector<8x128xf32>
    %c0_1 = arith.constant 0 : index
    %c0_2 = arith.constant 0 : index
    %1 = vector.load %arg2[%c0_1, %c0_2] : memref<8x128xf32, #tpu.memory_space<vmem>>, vector<8x128xf32>
    %c0_3 = arith.constant 0 : index
    %c0_4 = arith.constant 0 : index
    %2 = vector.load %arg3[%c0_3, %c0_4] : memref<128x128xf32, #tpu.memory_space<vmem>>, vector<128x128xf32>
    %cst = arith.constant dense<0.000000e+00> : vector<8x128xf32>
    %3 = tpu.matmul %1, %2, %cst {dimension_numbers = #tpu.dot_dimension_numbers<[1], [0], [0], [1], [0, 0, 1, 1], [], []>} : vector<8x128xf32>, vector<128x128xf32>, vector<8x128xf32> -> vector<8x128xf32>
    %c0_5 = arith.constant 0 : index
    %c0_6 = arith.constant 0 : index
    %4 = vector.load %arg5[%c0_5, %c0_6] : memref<1x128xf32, #tpu.memory_space<vmem>>, vector<1x128xf32>
    %5 = vector.broadcast %4 : vector<1x128xf32> to vector<8x128xf32>
    %6 = arith.addf %3, %5 : vector<8x128xf32>
    %c0_7 = arith.constant 0 : index
    %c0_8 = arith.constant 0 : index
    %7 = vector.load %arg4[%c0_7, %c0_8] : memref<128x128xf32, #tpu.memory_space<vmem>>, vector<128x128xf32>
    %cst_9 = arith.constant dense<0.000000e+00> : vector<8x128xf32>
    %8 = tpu.matmul %1, %7, %cst_9 {dimension_numbers = #tpu.dot_dimension_numbers<[1], [0], [0], [1], [0, 0, 1, 1], [], []>} : vector<8x128xf32>, vector<128x128xf32>, vector<8x128xf32> -> vector<8x128xf32>
    %c0_10 = arith.constant 0 : index
    %c0_11 = arith.constant 0 : index
    %9 = vector.load %arg6[%c0_10, %c0_11] : memref<1x128xf32, #tpu.memory_space<vmem>>, vector<1x128xf32>
    %10 = vector.broadcast %9 : vector<1x128xf32> to vector<8x128xf32>
    %11 = arith.addf %8, %10 : vector<8x128xf32>
    %cst_12 = arith.constant dense<0.000000e+00> : vector<8xf32>
    %12 = vector.multi_reduction <add>, %0, %cst_12 [1] : vector<8x128xf32> to vector<8xf32>
    %13 = vector.shape_cast %12 : vector<8xf32> to vector<8x1xf32>
    %cst_13 = arith.constant 3.125000e-02 : f32
    %14 = vector.broadcast %cst_13 : f32 to vector<8x1xf32>
    %15 = arith.mulf %13, %14 : vector<8x1xf32>
    %16 = arith.mulf %0, %0 : vector<8x128xf32>
    %cst_14 = arith.constant dense<0.000000e+00> : vector<8xf32>
    %17 = vector.multi_reduction <add>, %16, %cst_14 [1] : vector<8x128xf32> to vector<8xf32>
    %18 = vector.shape_cast %17 : vector<8xf32> to vector<8x1xf32>
    %cst_15 = arith.constant 3.125000e-02 : f32
    %19 = vector.broadcast %cst_15 : f32 to vector<8x1xf32>
    %20 = arith.mulf %18, %19 : vector<8x1xf32>
    %21 = arith.mulf %15, %15 : vector<8x1xf32>
    %22 = arith.subf %20, %21 : vector<8x1xf32>
    %23 = vector.broadcast %15 : vector<8x1xf32> to vector<8x128xf32>
    %24 = arith.subf %0, %23 : vector<8x128xf32>
    %cst_16 = arith.constant 9.99999996E-13 : f32
    %25 = vector.broadcast %cst_16 : f32 to vector<8x1xf32>
    %26 = arith.addf %22, %25 : vector<8x1xf32>
    %27 = math.rsqrt %26 : vector<8x1xf32>
    %28 = vector.broadcast %27 : vector<8x1xf32> to vector<8x128xf32>
    %29 = arith.mulf %24, %28 : vector<8x128xf32>
    %30 = arith.mulf %6, %29 : vector<8x128xf32>
    %31 = arith.addf %30, %11 : vector<8x128xf32>
    %c0_17 = arith.constant 0 : index
    %c0_18 = arith.constant 0 : index
    %32 = vector.load %arg7[%c0_17, %c0_18] : memref<8x128xf32, #tpu.memory_space<vmem>>, vector<8x128xf32>
    tpu.vector_store %arg7[%c0_17, %c0_18], %31 {strides = array<i32>} : memref<8x128xf32, #tpu.memory_space<vmem>>, vector<8x128xf32>,
    return
  }
  func.func @transform_0(%arg0: i32) -> (i32, i32) {
    %c0_i32 = arith.constant 0 : i32
    %c0_i32_0 = arith.constant 0 : i32
    return %arg0, %c0_i32 : i32, i32
  }
  func.func @transform_1(%arg0: i32) -> (i32, i32) {
    %c0_i32 = arith.constant 0 : i32
    %c0_i32_0 = arith.constant 0 : i32
    return %arg0, %c0_i32 : i32, i32
  }
  func.func @transform_2(%arg0: i32) -> (i32, i32) {
    %c0_i32 = arith.constant 0 : i32
    %c0_i32_0 = arith.constant 0 : i32
    %c0_i32_1 = arith.constant 0 : i32
    return %c0_i32, %c0_i32_0 : i32, i32
  }
  func.func @transform_3(%arg0: i32) -> (i32, i32) {
    %c0_i32 = arith.constant 0 : i32
    %c0_i32_0 = arith.constant 0 : i32
    %c0_i32_1 = arith.constant 0 : i32
    return %c0_i32, %c0_i32_0 : i32, i32
  }
  func.func @transform_4(%arg0: i32) -> (i32, i32) {
    %c0_i32 = arith.constant 0 : i32
    %c0_i32_0 = arith.constant 0 : i32
    %c0_i32_1 = arith.constant 0 : i32
    return %c0_i32, %c0_i32_0 : i32, i32
  }
  func.func @transform_5(%arg0: i32) -> (i32, i32) {
    %c0_i32 = arith.constant 0 : i32
    %c0_i32_0 = arith.constant 0 : i32
    %c0_i32_1 = arith.constant 0 : i32
    return %c0_i32, %c0_i32_0 : i32, i32
  }
  func.func @transform_6(%arg0: i32) -> (i32, i32) {
    %c0_i32 = arith.constant 0 : i32
    %c0_i32_0 = arith.constant 0 : i32
    return %arg0, %c0_i32 : i32, i32
  }
}

</mosaic_0001>

<bundles_post_ra>
// kernel: tpu_custom_call.1
= control target key start
LH: loop header
LB: loop body
LE: loop exit
PB: predicated region body
PF: predicated region fallthrough
CT: control target
= control target key end

     0   :  { %s1107_s0 = inlined_call_operand.hbm [shape: f32[16,128], index: 0, kind: input, shape index: {}]   ;;  %s1108_s1 = inlined_call_operand.hbm [shape: f32[16,128], index: 1, kind: input, shape index: {}]   ;;  %s1109_s2 = inlined_call_operand.hbm [shape: f32[128,128], index: 2, kind: input, shape index: {}]   ;;  %s1110_s3 = inlined_call_operand.hbm [shape: f32[128,128], index: 3, kind: input, shape index: {}]   ;;  %s1111_s4 = inlined_call_operand.vmem [shape: f32[1,128], index: 4, kind: input, shape index: {}]   ;;  %s1112_s5 = inlined_call_operand.vmem [shape: f32[1,128], index: 5, kind: input, shape index: {}]   ;;  %s1113_s6 = inlined_call_operand.hbm [shape: f32[16,128], index: 6, kind: output, shape index: {}]  }
   0x1   :  { %1117 = sst [smem:[#allocation19_spill]] %s1109_s2 }
   0x2   :  { %1118 = sst [smem:[#allocation20_spill]] %s1110_s3 }
   0x3   :  { %11 = vsyncpa [#allocation3], 0 }
   0x4   :  { %13 = vsyncpa [#allocation3 + $0x1], 0 }
   0x5   :  { %14 = vsyncpa [#allocation6], 0 }
   0x6   :  { %16 = vsyncpa [#allocation6 + $0x1], 0 }
   0x7   :  { %17 = vsyncpa [#allocation9], 0 }
   0x8   :  { %18 = vsyncpa [#allocation4], 0 }
   0x9   :  { %20 = vsyncpa [#allocation4 + $0x1], 0  ;;  %s912_s21 = smov 0   ;;  %s914_s22 = smov 0  }
   0xa   :  { %s916_s23 = smov 0   ;;  %s918_s24 = smov 0  }
   0xb LB: > { %1119 = sst [smem:[#allocation16_spill]] %s867_s23  ;;  %s936_s28 = sadd.s32 4294967295, %s871_s24   ;;  %s871_s24 = sphi %s918_s24, %s1131_s24   ;;  %s867_s23 = sphi %s916_s23, %s1133_s23   ;;  %s863_s22 = sphi %s914_s22, %s1135_s22   ;;  %s859_s21 = sphi %s912_s21, %s1134_s21  }
   0xc   : > { %s1120_s2 = sld [smem:[#allocation19_spill]]  ;;  %p577_p0 = scmp.ge.s32.totalorder %s871_s24, 1 }
   0xd   : > { %p47_p1 = scmp.eq.s32.totalorder %s936_s28, 0  ;;  %p193_p2 = scmp.lt.s32.totalorder %s871_s24, 3 }
   0xe   : > { %s873_s30 = smov [#allocation7]   ;;  %s1122_s3 = sld [smem:[#allocation20_spill]] }
   0xf   : > { %p941_p3 = pnand %p577_p0, %p193_p2  ;;  %s206_s7 = sshll.u32 %s873_s30, 4  ;;  %s207_s7 = int_to_ptr.vmem [resolvable:$true] %s206_s7 }
  0x10   : > { %s874_s11 = smov [#allocation8]   ;;  %s875_s13 = smov 128  }
  0x11   : > { %p609_p4 = pneg %p941_p3  ;;  %s220_s12 = sshll.u32 %s874_s11, 4  ;;  %s221_s12 = int_to_ptr.vmem [resolvable:$true] %s220_s12 }
  0x12   : > { %s204_s27 = sshll.u32 %s1120_s2, 4  ;;  %s876_s14 = smov 8   ;;  %s205_s27 = int_to_ptr.hbm [resolvable:$true] %s204_s27 }
  0x13   : > { %p610_p6 = pnand %p609_p4, %p47_p1  ;;  %s576_s15 = sadd.s32 4294967294, %s871_s24  }
  0x14   : > { %s218_s10 = sshll.u32 %s1122_s3, 4  ;;  %s955_s16 = sadd.s32 1, %s871_s24   ;;  %s219_s10 = int_to_ptr.hbm [resolvable:$true] %s218_s10 }
  0x15   : > { %612 = dma.hbm_to_vmem [thread:$0]  (!%p610_p6), %s205_s27, 2048, %s207_s7, [#allocation6], %s875_s13, %s875_s13, %s876_s14  }
  0x16   : > { %615 = dma.hbm_to_vmem [thread:$0]  (!%p610_p6), %s219_s10, 2048, %s221_s12, [#allocation9], %s875_s13, %s875_s13, %s876_s14  }
  0x17   : > { %1123 = sst [smem:[#allocation17_spill]] %s955_s16  ;;  %s30_s17 = ssub.s32 %s871_s24, %s955_s16 }
  0x18   : > { %s33_s18 = sadd.s32 1, %s867_s23  ;;  %p31_p7 = scmp.eq.s32.totalorder %s30_s17, 0 }
  0x19   : > { %p40_p8 = scmp.ne.s32.totalorder %s867_s23, %s863_s22  ;;  %p41_p9 = scmp.eq.s32.totalorder %s871_s24, 0 }
  0x1a   : > { %p46_p10 = scmp.ne.s32.totalorder %s863_s22, %s859_s21  ;;  %p180_p13 = scmp.eq.s32.totalorder %s936_s28, 1 }
  0x1b   : > { %s966_s19 = scalar_select %p31_p7, %s867_s23, %s33_s18  }
  0x1c   : > { %p968_p11 = por %p41_p9, %p40_p8  ;;  %p974_p12 = por %p47_p1, %p46_p10 }
  0x1d   : > { %1124 = sst [smem:[#allocation18_spill]] %s966_s19  ;;  %p186_p0 = scmp.eq.s32.totalorder %s576_s15, 1 }
  0x1e   : > { %p629_p2 = scmp.lt.s32.totalorder %s871_s24, 2  ;;  %s240_s26 = sand.u32 1, %s867_s23  }
  0x1f   : > { %p981_p4 = por %p180_p13, %p40_p8  ;;  %p985_p6 = por %p186_p0, %p46_p10 }
  0x20   : > { %s989_s7 = sshll.u32 %s240_s26, 3  ;;  %s582_s8 = sshll.u32 %s871_s24, 3 }
  0x21   : > { %s248_s11 = scalar_lea.hbm %s1107_s0, %s582_s8  ;;  %s244_s12 = scalar_lea.vmem [#allocation2], %s989_s7 }
  0x22   : > { %s252_s13 = sshll.u32 %s244_s12, 4  ;;  %s250_s14 = sshll.u32 %s248_s11, 4  ;;  %s253_s13 = int_to_ptr.vmem [resolvable:$true] %s252_s13  ;;  %s251_s14 = int_to_ptr.hbm [resolvable:$true] %s250_s14 }
  0x23   : > { %p998_p7 = pnand %p629_p2, %p968_p11  ;;  %s267_s2 = scalar_lea.hbm %s1108_s1, %s582_s8 }
  0x24   : > { %s259_s3 = sand.u32 1, %s871_s24   ;;  %s241_s19 = scalar_lea.sflag [#allocation3], %s240_s26 }
  0x25   : > { %s733_s9 = sshra.s32 %s251_s14, 4  ;;  %p737_p9 = pneg %p998_p7  ;;  %s734_s9 = int_to_ptr.hbm [resolvable:$true] %s733_s9 }
  0x26   : > { %s735_s10 = scalar_lea.hbm %s734_s9, 8  ;;  %s740_s12 = scalar_lea.hbm %s1107_s0, 16 }
  0x27   : > { %p736_p8 = scmp.ne.s32.totalorder %s734_s9, %s735_s10  ;;  %p741_p13 = scmp.lt.s32.totalorder %s734_s9, %s1107_s0 }
  0x28   : > { %p742_p0 = scmp.lt.s32.totalorder %s740_s12, %s735_s10 }
  0x29   : > { %p738_p10 = pnand %p737_p9, %p736_p8 }
  0x2a   : > { %p743_p2 = por %p742_p0, %p741_p13 }
  0x2b   : > { %p739_p11 = pneg %p738_p10 }
  0x2d   : > { %p744_p5 = pnand %p743_p2, %p739_p11 }
  0x2f   : > { %747 = shalt.err (!%p744_p5)
}
  0x30   : > { %619 = dma.hbm_to_vmem [thread:$0]  (!%p998_p7), %s251_s14, 128, %s253_s13, %s241_s19  }
  0x31   : > { %s269_s26 = sshll.u32 %s267_s2, 4  ;;  %s263_s8 = scalar_lea.vmem [#allocation5], %s989_s7  ;;  %s270_s26 = int_to_ptr.hbm [resolvable:$true] %s269_s26 }
  0x32   : > { %s271_s23 = sshll.u32 %s263_s8, 4  ;;  %s260_s20 = scalar_lea.sflag [#allocation6], %s259_s3  ;;  %s272_s23 = int_to_ptr.vmem [resolvable:$true] %s271_s23 }
  0x33   : > { %s763_s11 = sshra.s32 %s270_s26, 4  ;;  %s770_s12 = scalar_lea.hbm %s1108_s1, 16  ;;  %s764_s11 = int_to_ptr.hbm [resolvable:$true] %s763_s11 }
  0x34   : > { %s765_s16 = scalar_lea.hbm %s764_s11, 8  ;;  %p771_p5 = scmp.lt.s32.totalorder %s764_s11, %s1108_s1 }
  0x35   : > { %p766_p8 = scmp.ne.s32.totalorder %s764_s11, %s765_s16  ;;  %p772_p13 = scmp.lt.s32.totalorder %s770_s12, %s765_s16 }
  0x37   : > { %p768_p10 = pnand %p766_p8, %p737_p9  ;;  %p773_p0 = por %p772_p13, %p771_p5 }
  0x39   : > { %p769_p11 = pneg %p768_p10 }
  0x3b   : > { %p774_p2 = pnand %p773_p0, %p769_p11 }
  0x3d   : > { %777 = shalt.err (!%p774_p2)
}
  0x3e   : > { %622 = dma.hbm_to_vmem [thread:$0]  (!%p998_p7), %s270_s26, 128, %s272_s23, %s260_s20  }
  0x3f   : > { %280 = sbr.rel (%p941_p3) target bundleno = 243 (0xf3), region = 44  ;;  %s1034_s2 = sand.u32 (!%p941_p3), 1, %s863_s22  }
  0x40   : > { %s1037_s3 = sshll.u32 (!%p941_p3), %s1034_s2, 3  ;;  %s283_s7 = scalar_lea.sflag (!%p941_p3), [#allocation3], %s1034_s2 }
  0x41   : > { %s286_s16 = scalar_lea.vmem (!%p941_p3), [#allocation2], %s1037_s3 }
  0x44   : > { %838 = dma.done.wait (%p974_p12), %s283_s7, 128  }
  0x45   : > { %840 = vsyncadd (%p974_p12), %s283_s7, 4294967168  ;;  %s292_s23 = sand.u32 1, %s936_s28   ;;  %s296_s13 = scalar_lea.vmem [#allocation5], %s1037_s3 }
  0x46   : > { %s293_s29 = scalar_lea.sflag [#allocation6], %s292_s23 }
  0x47   : > { %842 = dma.done.wait (%p974_p12), %s293_s29, 128  }
  0x48   : > { %844 = vsyncadd (%p974_p12), %s293_s29, 4294967168 }
  0x49   : > { %846 = dma.done.wait (%p47_p1), [#allocation6], 2048  }
  0x4a   : > { %848 = vsyncadd (%p47_p1), [#allocation6], 4294965248 }
  0x4b   : > { %850 = dma.done.wait (%p47_p1), [#allocation9], 2048  }
  0x4c   : > { %852 = vsyncadd (%p47_p1), [#allocation9], 4294965248  ;;  %v358_v0 = vld [vmem:[#allocation7 + $0x78] sm:$0xff]  ;;  %v1059_v1 = vld [vmem:[%s286_s16] sm:$0xff]  ;;  %s592_s25 = sshll.u32 %s936_s28, 3  ;;  %s340_s28 = scalar_lea.vmem [#allocation10], %s1037_s3 }
  0x4d   : > { %v357_v2 = vld [vmem:[#allocation7 + $0x70] sm:$0xff]  ;;  %363 = vmatpush.msra.mxu0 %v358_v0  ;;  %423 = vadd.xlane.f32.xlu0 %v1059_v1  ;;  %v398_v3 = vld [vmem:[#allocation8 + $0x78] sm:$0xff]  ;;  %v356_v5 = vld [vmem:[#allocation7 + $0x68] sm:$0xff]  ;;  %v426_v9 = vmul.f32 %v1059_v1, %v1059_v1  ;;  %s459_s11 = scalar_lea.hbm %s1113_s6, %s592_s25  ;;  %s461_s9 = sshll.u32 %s340_s28, 4  ;;  %s462_s9 = int_to_ptr.vmem [resolvable:$true] %s461_s9 }
  0x4e   : > { %v397_v4 = vld [vmem:[#allocation8 + $0x70] sm:$0xff]  ;;  %403 = vmatpush.msra.mxu1 %v398_v3  ;;  %v396_v6 = vld [vmem:[#allocation8 + $0x68] sm:$0xff]  ;;  %v355_v7 = vld [vmem:[#allocation7 + $0x60] sm:$0xff]  ;;  %s463_s10 = sshll.u32 %s459_s11, 4  ;;  %s449_s12 = scalar_lea.sflag [#allocation4], %s1034_s2  ;;  %s464_s10 = int_to_ptr.hbm [resolvable:$true] %s463_s10 }
  0x4f   : > { %364 = vmatpush.msra.mxu0 %v357_v2  ;;  %v395_v8 = vld [vmem:[#allocation8 + $0x60] sm:$0xff]  ;;  %v354_v10 = vld [vmem:[#allocation7 + $0x58] sm:$0xff]  ;;  %v353_v12 = vld [vmem:[#allocation7 + $0x50] sm:$0xff]  ;;  %s807_s17 = sshra.s32 %s464_s10, 4  ;;  %s813_s23 = scalar_lea.hbm %s1113_s6, 16  ;;  %s808_s17 = int_to_ptr.hbm [resolvable:$true] %s807_s17 }
  0x50   : > { %404 = vmatpush.msra.mxu1 %v397_v4  ;;  %v394_v11 = vld [vmem:[#allocation8 + $0x58] sm:$0xff]  ;;  %v393_v13 = vld [vmem:[#allocation8 + $0x50] sm:$0xff]  ;;  %v352_v14 = vld [vmem:[#allocation7 + $0x48] sm:$0xff]  ;;  %s809_s19 = scalar_lea.hbm %s808_s17, 8  ;;  %p814_p7 = scmp.lt.s32.totalorder %s808_s17, %s1113_s6 }
  0x51   : > { %365 = vmatpush.msra.mxu0 %v356_v5  ;;  %v392_v15 = vld [vmem:[#allocation8 + $0x48] sm:$0xff]  ;;  %v351_v16 = vld [vmem:[#allocation7 + $0x40] sm:$0xff]  ;;  %v350_v18 = vld [vmem:[#allocation7 + $0x38] sm:$0xff]  ;;  %p810_p1 = scmp.ne.s32.totalorder %s808_s17, %s809_s19  ;;  %p815_p9 = scmp.lt.s32.totalorder %s813_s23, %s809_s19 }
  0x52   : > { %405 = vmatpush.msra.mxu1 %v396_v6  ;;  %v391_v17 = vld [vmem:[#allocation8 + $0x40] sm:$0xff]  ;;  %v390_v19 = vld [vmem:[#allocation8 + $0x38] sm:$0xff]  ;;  %v349_v20 = vld [vmem:[#allocation7 + $0x30] sm:$0xff] }
  0x53   : > { %366 = vmatpush.msra.mxu0 %v355_v7  ;;  %v389_v21 = vld [vmem:[#allocation8 + $0x30] sm:$0xff]  ;;  %v348_v22 = vld [vmem:[#allocation7 + $0x28] sm:$0xff]  ;;  %v347_v24 = vld [vmem:[#allocation7 + $0x20] sm:$0xff]  ;;  %p811_p3 = pnand %p810_p1, %p981_p4  ;;  %p816_p8 = por %p815_p9, %p814_p7 }
  0x54   : > { %406 = vmatpush.msra.mxu1 %v395_v8  ;;  %v388_v23 = vld [vmem:[#allocation8 + $0x28] sm:$0xff]  ;;  %v387_v25 = vld [vmem:[#allocation8 + $0x20] sm:$0xff]  ;;  %v346_v26 = vld [vmem:[#allocation7 + $0x18] sm:$0xff] }
  0x55   : > { %367 = vmatpush.msra.mxu0 %v354_v10  ;;  %427 = vadd.xlane.f32.xlu0 %v426_v9  ;;  %v386_v27 = vld [vmem:[#allocation8 + $0x18] sm:$0xff]  ;;  %v345_v28 = vld [vmem:[#allocation7 + $0x10] sm:$0xff]  ;;  %v344_v30 = vld [vmem:[#allocation7 + $0x8] sm:$0xff]  ;;  %p812_p12 = pneg %p811_p3 }
  0x56   : > { %407 = vmatpush.msra.mxu1 %v394_v11  ;;  %v385_v29 = vld [vmem:[#allocation8 + $0x10] sm:$0xff]  ;;  %v384_v31 = vld [vmem:[#allocation8 + $0x8] sm:$0xff]  ;;  %v343_v32 = vld [vmem:[#allocation7] sm:$0xff] }
  0x57   : > { %368 = vmatpush.msra.mxu0 %v353_v12  ;;  %v342_v33 = vld [vmem:[%s296_s13] sm:$0xff]  ;;  %v383_v34 = vld [vmem:[#allocation8] sm:$0xff]  ;;  %p817_p10 = pnand %p816_p8, %p812_p12 }
  0x58   : > { %408 = vmatpush.msra.mxu1 %v393_v13  ;;  %v669_v48 = vld [vmem:[%s1111_s4] ss:$0 sm:$0xff] }
  0x59   : > { %369 = vmatpush.msra.mxu0 %v352_v14  ;;  %v670_v50 = vld [vmem:[%s1112_s5] ss:$0 sm:$0xff] }
  0x5a   : > { %409 = vmatpush.msra.mxu1 %v392_v15 }
  0x5b   : > { %370 = vmatpush.msra.mxu0 %v351_v16 }
  0x5c   : > { %410 = vmatpush.msra.mxu1 %v391_v17 }
  0x5d   : > { %371 = vmatpush.msra.mxu0 %v350_v18 }
  0x5e   : > { %411 = vmatpush.msra.mxu1 %v390_v19 }
  0x5f   : > { %372 = vmatpush.msra.mxu0 %v349_v20 }
  0x60   : > { %412 = vmatpush.msra.mxu1 %v389_v21 }
  0x61   : > { %373 = vmatpush.msra.mxu0 %v348_v22 }
  0x62   : > { %413 = vmatpush.msra.mxu1 %v388_v23 }
  0x63   : > { %374 = vmatpush.msra.mxu0 %v347_v24 }
  0x64   : > { %414 = vmatpush.msra.mxu1 %v387_v25 }
  0x65   : > { %375 = vmatpush.msra.mxu0 %v346_v26 }
  0x66   : > { %415 = vmatpush.msra.mxu1 %v386_v27 }
  0x67   : > { %376 = vmatpush.msra.mxu0 %v345_v28 }
  0x68   : > { %416 = vmatpush.msra.mxu1 %v385_v29 }
  0x69   : > { %377 = vmatpush.msra.mxu0 %v344_v30 }
  0x6a   : > { %417 = vmatpush.msra.mxu1 %v384_v31 }
  0x6b   : > { %378 = vmatpush.msra.mxu0 %v343_v32 }
  0x6c   : > { %379 = vmatmul.f32.vlgmr.msra.gmra.mxu0 %v342_v33  ;;  %418 = vmatpush.msra.mxu1 %v383_v34 }
  0x6d   : > { %419 = vmatmul.f32.vlgmr.msra.gmra.mxu1 %v342_v33 }
  0xc0   : > { %v424_v35 = vpop.xlane.xlu0 %423 }
  0xc1   : > { %v425_v36 = vmul.f32 0.03125, %v424_v35 }
  0xc3   : > { %v430_v37 = vmul.f32 %v425_v36, %v425_v36  ;;  %v432_v51 = vsub.f32 %v1059_v1, %v425_v36 }
  0xc8   : > { %v428_v38 = vpop.xlane.xlu0 %427 }
  0xc9   : > { %v429_v39 = vmul.f32 0.03125, %v428_v38 }
  0xcb   : > { %v431_v40 = vsub.f32 %v429_v39, %v430_v37 }
  0xcd   : > { %v433_v41 = vadd.f32 1e-12, %v431_v40 }
  0xcf   : > { %671 = vrsqrt.f32 %v433_v41  ;;  %vm440_vm1 = vweird.f32 %v433_v41 }
  0xd5   : > { %v672_v42 = vpop.eup %671 }
  0xd6   : > { %v435_v43 = vmul.f32 %v672_v42, %v433_v41  ;;  %vm441_vm0 = vweird.f32 %v672_v42 }
  0xd7   : > { %vm442_vm2 = vmor %vm440_vm1, %vm441_vm0 }
  0xd8   : > { %v436_v44 = vmul.f32 %v672_v42, %v435_v43 }
  0xda   : > { %v437_v45 = vmul.f32 0.5, %v436_v44 }
  0xdc   : > { %v438_v46 = vsub.f32 1.5, %v437_v45 }
  0xde   : > { %v439_v47 = vmul.f32 %v672_v42, %v438_v46 }
  0xe0   : > { %v443_v49 = vsel %vm442_vm2, %v672_v42, %v439_v47 }
  0xe1   : > { %v444_v54 = vmul.f32 %v443_v49, %v432_v51 }
  0xe9   : > { %v380_v52 = vpop.f32.mrf.mxu0 }
  0xea   : > { %v381_v53 = vadd.f32 %v669_v48, %v380_v52  ;;  %v420_v55 = vpop.f32.mrf.mxu1 }
  0xeb   : > { %v421_v56 = vadd.f32 %v670_v50, %v420_v55 }
  0xec   : > { %v445_v57 = vmul.f32 %v444_v54, %v381_v53 }
  0xee   : > { %v446_v58 = vadd.f32 %v445_v57, %v421_v56 }
  0xf0   : > { %447 = vst [vmem:[%s340_s28] sm:$0xff] %v446_v58 }
  0xf1   : > { %820 = shalt.err (!%p817_p10)
}
  0xf2   : > { %607 = dma.vmem_to_hbm [thread:$0]  (%p981_p4), %s462_s9, 128, %s464_s10, %s449_s12  }
  0xf3 PF: > { %s475_s2 = sand.u32 1, %s859_s21   ;;  %p1130_p11 = scmp.ge.s32.totalorder %s871_s24, 2 }
  0xf4   : > { %s476_s13 = scalar_lea.sflag [#allocation4], %s475_s2 }
  0xf5   : > { %p624_p5 = pnand %p1130_p11, %p985_p6 }
  0xf7   : > { %p625_p13 = pneg %p624_p5 }
  0xf9   : > { %854 = dma.done.wait (%p625_p13), %s476_s13, 128  }
  0xfa   : > { %856 = vsyncadd (%p625_p13), %s476_s13, 4294967168  ;;  %s1131_s24 = sld [smem:[#allocation17_spill]]  ;;  %s1134_s21 = smov %s863_s22 }
  0xfb   : > { %s1132_s25 = sld [smem:[#allocation16_spill]] }
  0xfc   : > { %s1133_s23 = sld [smem:[#allocation18_spill]] }
 0x100   : > { %p23_p0 = scmp.ge.s32.totalorder %s1131_s24, 4  }
 0x101   : > { %s1135_s22 = smov %s1132_s25 }
 0x102   :  { %25 = sbr.rel (!%p23_p0) target bundleno = 11 (0xb), region = 110 }
 0x107   :  { %482 = vsyncpa [#allocation3], 1 }
 0x108   :  { %484 = vsyncpa [#allocation3 + $0x1], 1 }
 0x109   :  { %485 = vsyncpa [#allocation6], 1 }
 0x10a   :  { %487 = vsyncpa [#allocation6 + $0x1], 1 }
 0x10b   :  { %488 = vsyncpa [#allocation9], 1 }
 0x10c   :  { %489 = vsyncpa [#allocation4], 1 }
 0x10d   :  { %491 = vsyncpa [#allocation4 + $0x1], 1 }

</bundles_post_ra>
